<compile_context>
chip_gen: v7x
topology: tpu7x:2x2x1
jax: 0.10.0
libtpu: 0.0.40
codegen_flags: <defaults>
</compile_context>

<pallas_src>
import functools

import jax
import jax.numpy as jnp
from jax import lax
from jax.experimental import pallas as pl
from jax.experimental.pallas import tpu as pltpu


def _pick_tile(dim, candidates):
    """Largest candidate tile that evenly divides dim, else the full dim."""
    for c in candidates:
        if dim % c == 0:
            return c
    return dim


# ----------------------------------------------------------------------------
# Tiled linear projection kernel: y = x @ W + b   (W stored as [in, out])
# ----------------------------------------------------------------------------
def _linear_kernel(x_ref, w_ref, b_ref, o_ref, acc_ref):
    @pl.when(pl.program_id(2) == 0)
    def _():
        acc_ref[...] = jnp.zeros_like(acc_ref)

    # Native-dtype operands on the MXU, f32 accumulation.
    acc_ref[...] += jnp.dot(x_ref[...], w_ref[...],
                            preferred_element_type=jnp.float32)

    @pl.when(pl.program_id(2) == pl.num_programs(2) - 1)
    def _():
        o_ref[...] = (acc_ref[...] + b_ref[...].astype(jnp.float32)
                      ).astype(o_ref.dtype)


def linear(x2d, w, b):
    M, K = x2d.shape
    N = w.shape[1]
    tm = _pick_tile(M, (512, 256, 128))
    tn = _pick_tile(N, (512, 256, 128))
    tk = _pick_tile(K, (512, 256))
    grid = (M // tm, N // tn, K // tk)

    itemsize = jnp.dtype(x2d.dtype).itemsize
    cost = pl.CostEstimate(
        flops=2 * M * N * K,
        transcendentals=0,
        bytes_accessed=(M * K + K * N + M * N + N) * itemsize,
    )

    return pl.pallas_call(
        _linear_kernel,
        out_shape=jax.ShapeDtypeStruct((M, N), x2d.dtype),
        grid=grid,
        in_specs=[
            pl.BlockSpec((tm, tk), lambda i, j, kk: (i, kk)),
            pl.BlockSpec((tk, tn), lambda i, j, kk: (kk, j)),
            pl.BlockSpec((1, tn), lambda i, j, kk: (0, j)),
        ],
        out_specs=pl.BlockSpec((tm, tn), lambda i, j, kk: (i, j)),
        scratch_shapes=[pltpu.VMEM((tm, tn), jnp.float32)],
        compiler_params=pltpu.CompilerParams(
            dimension_semantics=("parallel", "parallel", "arbitrary")),
        cost_estimate=cost,
    )(x2d, w, b.reshape(1, N))


# ----------------------------------------------------------------------------
# Attention core: per (batch, Sq-tile) block in [B, S, H] layout.
# Heads are static column slices of the H axis (no wrapper transposes).
#   s = (q_h @ k_h^T) * scale (+ bias_h) ; p = softmax(s) ; p = nan->0
#   out_h = p @ v_h ; written back into its H-column range.
# ----------------------------------------------------------------------------
def _attn_compute(q_ref, k_ref, v_ref, bias_ref, o_ref, *, scale,
                  num_heads, head_dim):
    q = q_ref[0]    # (tq, H)  native dtype
    k = k_ref[0]    # (Sk, H)
    v = v_ref[0]    # (Sk, H)

    for h in range(num_heads):  # static unroll over heads
        lo = h * head_dim
        qh = q[:, lo:lo + head_dim]          # (tq, d)
        kh = k[:, lo:lo + head_dim]          # (Sk, d)
        vh = v[:, lo:lo + head_dim]          # (Sk, d)

        # q @ k^T with f32 accumulation (contract the head dim of both).
        s = lax.dot_general(qh, kh, (((1,), (1,)), ((), ())),
                            preferred_element_type=jnp.float32)
        s = s * scale
        if bias_ref is not None:
            s = s + bias_ref[0, h].astype(jnp.float32)   # (tq, Sk)

        m = jnp.max(s, axis=-1, keepdims=True)
        e = jnp.exp(s - m)
        denom = jnp.sum(e, axis=-1, keepdims=True)
        p = e * pl.reciprocal(denom)                     # EUP, not VALU divide
        # torch.where(torch.isnan(x), 0, x)
        p = jnp.where(jnp.isnan(p), jnp.zeros_like(p), p)

        ctx = jnp.dot(p.astype(vh.dtype), vh,
                      preferred_element_type=jnp.float32)  # (tq, d)
        o_ref[0, :, lo:lo + head_dim] = ctx.astype(o_ref.dtype)


def _attn_kernel_nobias(q_ref, k_ref, v_ref, o_ref, *, scale, num_heads,
                        head_dim):
    _attn_compute(q_ref, k_ref, v_ref, None, o_ref, scale=scale,
                  num_heads=num_heads, head_dim=head_dim)


def _attn_kernel_bias(q_ref, k_ref, v_ref, bias_ref, o_ref, *, scale,
                      num_heads, head_dim):
    _attn_compute(q_ref, k_ref, v_ref, bias_ref, o_ref, scale=scale,
                  num_heads=num_heads, head_dim=head_dim)


def _attention_core(qp, kp, vp, attn_bias, scale, num_heads):
    B, Sq, H = qp.shape
    Sk = kp.shape[1]
    d = H // num_heads
    tq = _pick_tile(Sq, (512, 256, 128))
    grid = (B, Sq // tq)

    itemsize = jnp.dtype(qp.dtype).itemsize
    bytes_accessed = (qp.size + kp.size + vp.size + B * Sq * H) * itemsize
    if attn_bias is not None:
        bytes_accessed += attn_bias.size * jnp.dtype(attn_bias.dtype).itemsize
    cost = pl.CostEstimate(
        flops=4 * B * num_heads * Sq * Sk * d,
        transcendentals=B * num_heads * Sq * Sk,
        bytes_accessed=int(bytes_accessed),
    )

    in_specs = [
        pl.BlockSpec((1, tq, H), lambda b, i: (b, i, 0)),
        pl.BlockSpec((1, Sk, H), lambda b, i: (b, 0, 0)),
        pl.BlockSpec((1, Sk, H), lambda b, i: (b, 0, 0)),
    ]
    out_spec = pl.BlockSpec((1, tq, H), lambda b, i: (b, i, 0))

    if attn_bias is None:
        kernel = functools.partial(_attn_kernel_nobias, scale=scale,
                                   num_heads=num_heads, head_dim=d)
        args = (qp, kp, vp)
    else:
        if attn_bias.shape[0] == B:
            bias_map = lambda b, i: (b, 0, i, 0)
        else:  # broadcast batch dim
            bias_map = lambda b, i: (0, 0, i, 0)
        in_specs.append(pl.BlockSpec((1, num_heads, tq, Sk), bias_map))
        kernel = functools.partial(_attn_kernel_bias, scale=scale,
                                   num_heads=num_heads, head_dim=d)
        args = (qp, kp, vp, attn_bias)

    return pl.pallas_call(
        kernel,
        out_shape=jax.ShapeDtypeStruct((B, Sq, H), qp.dtype),
        grid=grid,
        in_specs=in_specs,
        out_specs=out_spec,
        compiler_params=pltpu.CompilerParams(
            dimension_semantics=("parallel", "parallel")),
        cost_estimate=cost,
    )(*args)


# ----------------------------------------------------------------------------
# Full module forward
# ----------------------------------------------------------------------------
def multi_head_attention(q, k, v, params, num_heads, attn_bias=None):
    B, Sq, H = q.shape
    Sk = k.shape[1]
    d = H // num_heads
    scale = d ** (-0.5)

    # Q/K/V projections (tiled Pallas matmuls); stay in [B, S, H] layout.
    qp = linear(q.reshape(B * Sq, H), params["wq"], params["bq"]).reshape(B, Sq, H)
    kp = linear(k.reshape(B * Sk, H), params["wk"], params["bk"]).reshape(B, Sk, H)
    vp = linear(v.reshape(B * Sk, H), params["wv"], params["bv"]).reshape(B, Sk, H)

    ctx = _attention_core(qp, kp, vp, attn_bias, scale, num_heads)  # [B,Sq,H]

    out = linear(ctx.reshape(B * Sq, H), params["wo"], params["bo"]).reshape(B, Sq, H)
    return out


# ----------------------------------------------------------------------------
# Deterministic parameter init (mimics nn.Linear: U(-1/sqrt(in), 1/sqrt(in)))
# ----------------------------------------------------------------------------
def init_params(key, hidden_size, num_heads):
    d = hidden_size // num_heads
    keys = jax.random.split(key, 8)

    def lin(kw, kb, fan_in, fan_out):
        bound = 1.0 / (fan_in ** 0.5)
        w = jax.random.uniform(kw, (fan_in, fan_out), jnp.float32, -bound, bound)
        b = jax.random.uniform(kb, (fan_out,), jnp.float32, -bound, bound)
        return w, b

    wq, bq = lin(keys[0], keys[1], hidden_size, num_heads * d)
    wk, bk = lin(keys[2], keys[3], hidden_size, num_heads * d)
    wv, bv = lin(keys[4], keys[5], hidden_size, num_heads * d)
    wo, bo = lin(keys[6], keys[7], num_heads * d, hidden_size)
    return dict(wq=wq, bq=bq, wk=wk, bk=bk, wv=wv, bv=bv, wo=wo, bo=bo)


# ----------------------------------------------------------------------------
# Pure-JAX reference for sanity checking
# ----------------------------------------------------------------------------
def reference(q, k, v, params, num_heads, attn_bias=None):
    B, Sq, H = q.shape
    Sk = k.shape[1]
    d = H // num_heads
    scale = d ** (-0.5)
    qp = (q.reshape(B * Sq, H) @ params["wq"] + params["bq"]).reshape(B, Sq, num_heads, d)
    kp = (k.reshape(B * Sk, H) @ params["wk"] + params["bk"]).reshape(B, Sk, num_heads, d)
    vp = (v.reshape(B * Sk, H) @ params["wv"] + params["bv"]).reshape(B, Sk, num_heads, d)
    qh = jnp.transpose(qp, (0, 2, 1, 3)) * scale
    kh = jnp.transpose(kp, (0, 2, 1, 3))
    vh = jnp.transpose(vp, (0, 2, 1, 3))
    s = jnp.einsum("bhqd,bhkd->bhqk", qh, kh)
    if attn_bias is not None:
        s = s + attn_bias
    p = jax.nn.softmax(s, axis=-1)
    p = jnp.where(jnp.isnan(p), 0.0, p)
    ctx = jnp.einsum("bhqk,bhkd->bhqd", p, vh)
    ctx = jnp.transpose(ctx, (0, 2, 1, 3)).reshape(B * Sq, num_heads * d)
    return (ctx @ params["wo"] + params["bo"]).reshape(B, Sq, H)


if __name__ == "__main__":
    B, S, H, NH = 2, 8, 32, 4

    key = jax.random.PRNGKey(0)
    kq, kk, kv, kp, kb = jax.random.split(key, 5)
    q = jax.random.normal(kq, (B, S, H), jnp.float32)
    k = jax.random.normal(kk, (B, S, H), jnp.float32)
    v = jax.random.normal(kv, (B, S, H), jnp.float32)
    params = init_params(kp, H, NH)

    # Bias-free path (zero bias never materialized).
    out = multi_head_attention(q, k, v, params, NH, attn_bias=None)
    out = jax.block_until_ready(out)
    ref = reference(q, k, v, params, NH, attn_bias=None)
    assert out.shape == (B, S, H)
    assert jnp.allclose(out, ref, atol=1e-4, rtol=1e-4)

    # Biased path.
    bias = 0.1 * jax.random.normal(kb, (B, NH, S, S), jnp.float32)
    out_b = multi_head_attention(q, k, v, params, NH, attn_bias=bias)
    out_b = jax.block_until_ready(out_b)
    ref_b = reference(q, k, v, params, NH, attn_bias=bias)
    assert jnp.allclose(out_b, ref_b, atol=1e-4, rtol=1e-4)

    print("KERNEL_OK")
</pallas_src>

<mosaic_0001>
module attributes {stable_mosaic.version = 11 : i64} {
  func.func @_linear_kernel(%arg0: i32, %arg1: i32, %arg2: i32, %arg3: memref<16x32xf32, #tpu.memory_space<vmem>>, %arg4: memref<32x32xf32, #tpu.memory_space<vmem>>, %arg5: memref<1x32xf32, #tpu.memory_space<vmem>>, %arg6: memref<16x32xf32, #tpu.memory_space<vmem>>, %arg7: memref<16x32xf32, #tpu.memory_space<vmem>>) attributes {dimension_semantics = [#tpu.dimension_semantics<parallel>, #tpu.dimension_semantics<parallel>, #tpu.dimension_semantics<arbitrary>], iteration_bounds = array<i64: 1, 1, 1>, scalar_prefetch = 0 : i64, scratch_operands = 1 : i64, tpu.core_type = #tpu.core_type<tc>, window_params = [{transform_indices = @transform_0, window_bounds = array<i64: 16, 32>}, {transform_indices = @transform_1, window_bounds = array<i64: 32, 32>}, {transform_indices = @transform_2, window_bounds = array<i64: 1, 32>}, {transform_indices = @transform_3, window_bounds = array<i64: 16, 32>}]} {
    %c0_i32 = arith.constant 0 : i32
    %0 = arith.cmpi eq, %arg2, %c0_i32 : i32
    %1 = arith.extui %0 : i1 to i32
    %c0_i32_0 = arith.constant 0 : i32
    %2 = arith.cmpi ne, %1, %c0_i32_0 : i32
    scf.if %2 {
      %cst_10 = arith.constant 0.000000e+00 : f32
      %12 = vector.broadcast %cst_10 : f32 to vector<16x32xf32>
      %c0_11 = arith.constant 0 : index
      %c0_12 = arith.constant 0 : index
      %13 = vector.load %arg7[%c0_11, %c0_12] : memref<16x32xf32, #tpu.memory_space<vmem>>, vector<16x32xf32>
      tpu.vector_store %arg7[%c0_11, %c0_12], %12 {strides = array<i32>} : memref<16x32xf32, #tpu.memory_space<vmem>>, vector<16x32xf32>,
    } else {
    }
    %c0 = arith.constant 0 : index
    %c0_1 = arith.constant 0 : index
    %3 = vector.load %arg7[%c0, %c0_1] : memref<16x32xf32, #tpu.memory_space<vmem>>, vector<16x32xf32>
    %c0_2 = arith.constant 0 : index
    %c0_3 = arith.constant 0 : index
    %4 = vector.load %arg3[%c0_2, %c0_3] : memref<16x32xf32, #tpu.memory_space<vmem>>, vector<16x32xf32>
    %c0_4 = arith.constant 0 : index
    %c0_5 = arith.constant 0 : index
    %5 = vector.load %arg4[%c0_4, %c0_5] : memref<32x32xf32, #tpu.memory_space<vmem>>, vector<32x32xf32>
    %cst = arith.constant dense<0.000000e+00> : vector<16x32xf32>
    %6 = tpu.matmul %4, %5, %cst {dimension_numbers = #tpu.dot_dimension_numbers<[1], [0], [0], [1], [0, 0, 1, 1], [], []>} : vector<16x32xf32>, vector<32x32xf32>, vector<16x32xf32> -> vector<16x32xf32>
    %7 = arith.addf %3, %6 : vector<16x32xf32>
    %c0_6 = arith.constant 0 : index
    %c0_7 = arith.constant 0 : index
    %8 = vector.load %arg7[%c0_6, %c0_7] : memref<16x32xf32, #tpu.memory_space<vmem>>, vector<16x32xf32>
    tpu.vector_store %arg7[%c0_6, %c0_7], %7 {strides = array<i32>} : memref<16x32xf32, #tpu.memory_space<vmem>>, vector<16x32xf32>,
    %c0_i32_8 = arith.constant 0 : i32
    %9 = arith.cmpi eq, %arg2, %c0_i32_8 : i32
    %10 = arith.extui %9 : i1 to i32
    %c0_i32_9 = arith.constant 0 : i32
    %11 = arith.cmpi ne, %10, %c0_i32_9 : i32
    scf.if %11 {
      %c0_10 = arith.constant 0 : index
      %c0_11 = arith.constant 0 : index
      %12 = vector.load %arg7[%c0_10, %c0_11] : memref<16x32xf32, #tpu.memory_space<vmem>>, vector<16x32xf32>
      %c0_12 = arith.constant 0 : index
      %c0_13 = arith.constant 0 : index
      %13 = vector.load %arg5[%c0_12, %c0_13] : memref<1x32xf32, #tpu.memory_space<vmem>>, vector<1x32xf32>
      %14 = vector.broadcast %13 : vector<1x32xf32> to vector<16x32xf32>
      %15 = arith.addf %12, %14 : vector<16x32xf32>
      %c0_14 = arith.constant 0 : index
      %c0_15 = arith.constant 0 : index
      %16 = vector.load %arg6[%c0_14, %c0_15] : memref<16x32xf32, #tpu.memory_space<vmem>>, vector<16x32xf32>
      tpu.vector_store %arg6[%c0_14, %c0_15], %15 {strides = array<i32>} : memref<16x32xf32, #tpu.memory_space<vmem>>, vector<16x32xf32>,
    } else {
    }
    return
  }
  func.func @transform_0(%arg0: i32, %arg1: i32, %arg2: i32) -> (i32, i32) {
    %c0_i32 = arith.constant 0 : i32
    return %arg0, %arg2 : i32, i32
  }
  func.func @transform_1(%arg0: i32, %arg1: i32, %arg2: i32) -> (i32, i32) {
    %c0_i32 = arith.constant 0 : i32
    return %arg2, %arg1 : i32, i32
  }
  func.func @transform_2(%arg0: i32, %arg1: i32, %arg2: i32) -> (i32, i32) {
    %c0_i32 = arith.constant 0 : i32
    %c0_i32_0 = arith.constant 0 : i32
    return %c0_i32, %arg1 : i32, i32
  }
  func.func @transform_3(%arg0: i32, %arg1: i32, %arg2: i32) -> (i32, i32) {
    %c0_i32 = arith.constant 0 : i32
    return %arg0, %arg1 : i32, i32
  }
}

</mosaic_0001>

<bundles_post_ra>
// kernel: tpu_custom_call.1
= control target key start
LH: loop header
LB: loop body
LE: loop exit
PB: predicated region body
PF: predicated region fallthrough
CT: control target
= control target key end

     0   :  { %8 = vsyncpa [#allocation4], 0  ;;  %s366_s0 = inlined_call_operand.hbm [shape: f32[16,32], index: 0, kind: input, shape index: {}]   ;;  %s367_s1 = inlined_call_operand.hbm [shape: f32[32,32], index: 1, kind: input, shape index: {}]   ;;  %s368_s2 = inlined_call_operand.vmem [shape: f32[1,32], index: 2, kind: input, shape index: {}]   ;;  %s369_s3 = inlined_call_operand.hbm [shape: f32[16,32], index: 3, kind: output, shape index: {}]  }
   0x1   :  { %9 = vsyncpa [#allocation7], 0 }
   0x2   :  { %10 = vsyncpa [#allocation5], 0  ;;  %s284_s12 = smov [#allocation3]   ;;  %s212_s16 = scalar_lea.hbm %s366_s0, 256 }
   0x3   :  { %s16_s13 = sshll.u32 %s284_s12, 4  ;;  %p213_p0 = scmp.ne.s32.totalorder %s366_s0, %s212_s16  ;;  %s17_s13 = int_to_ptr.vmem [resolvable:$true] %s16_s13 }
   0x4   :  { %p216_p1 = scmp.lt.u32.totalorder %s212_s16, %s366_s0 }
   0x6   :  { %p218_p2 = pnand %p216_p1, %p213_p0 }
   0x8   :  { %221 = shalt.err (!%p218_p2)
}
   0x9   :  { %s222_s21 = scalar_lea.vmem %s17_s13, 256  ;;  %p227_p4 = scmp.lt.s32.totalorder %s17_s13, %s17_s13 }
   0xa   :  { %p223_p3 = scmp.ne.s32.totalorder %s17_s13, %s222_s21  ;;  %p228_p5 = scmp.lt.s32.totalorder %s222_s21, %s222_s21 }
   0xc   :  { %p229_p6 = por %p228_p5, %p227_p4 }
   0xe   :  { %p230_p7 = pnand %p229_p6, %p223_p3 }
  0x10   :  { %233 = shalt.err (!%p230_p7)
}
  0x11   :  { %s285_s22 = smov 128   ;;  %s286_s23 = smov 8  }
  0x12   :  { %22 = dma.hbm_to_vmem [thread:$0]  %s366_s0, 256, %s17_s13, [#allocation4], %s285_s22, %s285_s22, %s286_s23  }
  0x13   :  { %s287_s26 = smov [#allocation6]   ;;  %s234_s30 = scalar_lea.hbm %s367_s1, 512 }
  0x14   :  { %s28_s27 = sshll.u32 %s287_s26, 4  ;;  %p235_p8 = scmp.ne.s32.totalorder %s367_s1, %s234_s30  ;;  %s29_s27 = int_to_ptr.vmem [resolvable:$true] %s28_s27 }
  0x15   :  { %p238_p9 = scmp.lt.u32.totalorder %s234_s30, %s367_s1 }
  0x17   :  { %p240_p10 = pnand %p238_p9, %p235_p8 }
  0x19   :  { %243 = shalt.err (!%p240_p10)
}
  0x1a   :  { %s244_s8 = scalar_lea.vmem %s29_s27, 512  ;;  %p249_p12 = scmp.lt.s32.totalorder %s29_s27, %s29_s27 }
  0x1b   :  { %p245_p11 = scmp.ne.s32.totalorder %s29_s27, %s244_s8  ;;  %p250_p13 = scmp.lt.s32.totalorder %s244_s8, %s244_s8 }
  0x1d   :  { %p251_p0 = por %p250_p13, %p249_p12 }
  0x1f   :  { %p252_p1 = pnand %p251_p0, %p245_p11 }
  0x21   :  { %255 = shalt.err (!%p252_p1)
}
  0x22   :  { %34 = dma.hbm_to_vmem [thread:$0]  %s367_s1, 512, %s29_s27, [#allocation7], %s285_s22, %s285_s22, %s286_s23  }
  0x23   :  { %278 = dma.done.wait [#allocation4], 256  }
  0x24   :  { %279 = vsyncadd [#allocation4], 4294967040 }
  0x25   :  { %280 = dma.done.wait [#allocation7], 512  }
  0x26   :  { %281 = vsyncadd [#allocation7], 4294966784  ;;  %vm47_vm0 = vcmask 261120   ;;  %v288_v0 = vmov 0.0   ;;  %v54_v1 = vld [vmem:[#allocation6] sm:$0xff]  ;;  %v55_v2 = vld [vmem:[#allocation6 + $0x8] sm:$0xff] }
  0x27   :  { %49 = vst.msk [vmem:[#allocation2 + $0x8] sm:$0xff] %vm47_vm0, %v288_v0  ;;  %48 = vst.msk [vmem:[#allocation2] sm:$0xff] %vm47_vm0, %v288_v0  ;;  %v56_v3 = vld [vmem:[#allocation6 + $0x10] sm:$0xff]  ;;  %v198_v4 = vpack.c.bf16 %v55_v2, %v54_v1  ;;  %v57_v5 = vld [vmem:[#allocation6 + $0x18] sm:$0xff]  ;;  %s289_s11 = smov [#allocation8]  }
  0x28   :  { %v52_v6 = vld [vmem:[#allocation3] sm:$0xff]  ;;  %v202_v7 = vpack.c.bf16 %v57_v5, %v56_v3  ;;  %v53_v8 = vld [vmem:[#allocation3 + $0x8] sm:$0xff]  ;;  %v180_v15 = vld [vmem:[%s368_s2] ss:$0 sm:$0xff]  ;;  %s165_s12 = sshll.u32 %s289_s11, 4  ;;  %s166_s12 = int_to_ptr.vmem [resolvable:$true] %s165_s12 }
  0x29   :  { %195 = vmatprep.mubr.msk.f32.mxu0 %vm47_vm0, %v52_v6  ;;  %199 = vmatprep.subr.bf16.mxu0 %v198_v4  ;;  %s256_s13 = scalar_lea.vmem %s166_s12, 256  ;;  %p261_p3 = scmp.lt.s32.totalorder %s166_s12, %s166_s12 }
  0x2a   :  { %201 = vmatpush3.bf16.msra.mxu0 %v198_v4  ;;  %p257_p2 = scmp.ne.s32.totalorder %s166_s12, %s256_s13  ;;  %p262_p4 = scmp.lt.s32.totalorder %s256_s13, %s256_s13 }
  0x2b   :  { %203 = vmatprep.subr.bf16.mxu0 %v202_v7 }
  0x2c   :  { %p263_p5 = por %p262_p4, %p261_p3 }
  0x2e   :  { %205 = vmatpush3.bf16.msra.mxu0 %v202_v7  ;;  %v51_v9 = vld [vmem:[#allocation2 + $0x8] sm:$0xff]  ;;  %v50_v10 = vld [vmem:[#allocation2] sm:$0xff]  ;;  %p264_p6 = pnand %p263_p5, %p257_p2 }
  0x31   :  { %196 = vmatmul.mubr.msk.f32.vlgmr.msra.gmra.mrb[0].mxu0 %vm47_vm0, %v53_v8 }
 0x104   :  { %v197_v11 = vpop.f32.mrb[0].mxu0 }
 0x105   :  { %v141_v12 = vadd.f32 %v197_v11, %v51_v9  ;;  %v131_v13 = vpop.f32.mrb[1].mxu0 }
 0x106   :  { %v140_v14 = vadd.f32 %v131_v13, %v50_v10 }
 0x107   :  { %143 = vst.msk [vmem:[#allocation2 + $0x8] sm:$0xff] %vm47_vm0, %v141_v12 }
 0x108   :  { %142 = vst.msk [vmem:[#allocation2] sm:$0xff] %vm47_vm0, %v140_v14 }
 0x10e   :  { %v148_v16 = vld [vmem:[#allocation2 + $0x8] sm:$0xff] }
 0x10f   :  { %v147_v17 = vld [vmem:[#allocation2] sm:$0xff]  ;;  %v157_v18 = vadd.f32 %v180_v15, %v148_v16 }
 0x110   :  { %v156_v19 = vadd.f32 %v180_v15, %v147_v17 }
 0x111   :  { %159 = vst.msk [vmem:[#allocation8 + $0x8] sm:$0xff] %vm47_vm0, %v157_v18 }
 0x112   :  { %158 = vst.msk [vmem:[#allocation8] sm:$0xff] %vm47_vm0, %v156_v19 }
 0x113   :  { %267 = shalt.err (!%p264_p6)
}
 0x114   :  { %s268_s15 = scalar_lea.hbm %s369_s3, 256 }
 0x115   :  { %p269_p7 = scmp.ne.s32.totalorder %s369_s3, %s268_s15  ;;  %p272_p8 = scmp.lt.u32.totalorder %s268_s15, %s369_s3 }
 0x117   :  { %p274_p9 = pnand %p272_p8, %p269_p7 }
 0x119   :  { %277 = shalt.err (!%p274_p9)
}
 0x11a   :  { %171 = dma.vmem_to_hbm [thread:$0]  %s166_s12, 256, %s369_s3, [#allocation5], %s285_s22, %s285_s22, %s286_s23  }
 0x11b   :  { %282 = dma.done.wait [#allocation5], 256  }
 0x11c   :  { %283 = vsyncadd [#allocation5], 4294967040 }
 0x11d   :  { %175 = vsyncpa [#allocation4], 1 }
 0x11e   :  { %176 = vsyncpa [#allocation7], 1 }
 0x11f   :  { %177 = vsyncpa [#allocation5], 1 }

</bundles_post_ra>
